<compile_context>
chip_gen: v7x
topology: tpu7x:2x2x1
jax: 0.10.0
libtpu: 0.0.40
codegen_flags: <defaults>
</compile_context>

<pallas_src>
import functools

import jax
import jax.numpy as jnp
from jax.experimental import pallas as pl
from jax.experimental.pallas import tpu as pltpu

LANES = 128
SUBLANES = 8
ACC_ROWS = 64          # (64,128) accumulator block = 8 independent vreg chains
MAX_TILE_ROWS = 8192   # 4 MiB f32 per input block; 16 MiB double-buffered total


def _round_up(x, m):
    return ((x + m - 1) // m) * m


def _cdiv(a, b):
    return -(-a // b)


@functools.lru_cache(maxsize=None)
def _num_tensorcores():
    """Best-effort TensorCore count per device; defaults to the safe value 1."""
    try:
        info = pltpu.get_tpu_info()
    except Exception:
        return 1
    for attr in ("num_cores", "num_tensorcores", "tensorcore_count",
                 "cores_per_chip", "core_count"):
        v = getattr(info, attr, None)
        if isinstance(v, int) and v >= 1:
            return min(int(v), 2)
    return 1


def _huber_kernel(pred_ref, gt_ref, out_ref, *, total_rows, tile_rows,
                  steps_per_core, acc_rows, has_tail, needs_oob_guard):
    c = pl.program_id(0)   # core / parallel axis
    i = pl.program_id(1)   # streaming (reduction) axis

    @pl.when(i == 0)
    def _init():
        out_ref[...] = jnp.zeros_like(out_ref)

    # Logical (unclamped) block index -> global row offset.
    b = c * steps_per_core + i
    row0 = b * tile_rows

    def accumulate(d):
        # smooth_l1 (beta = 1): 0.5*d^2 if |d| < 1 else |d| - 0.5
        ad = jnp.abs(d)
        loss = jnp.where(ad < 1.0, 0.5 * d * d, ad - 0.5)
        # Fold (tile_rows,128) -> (acc_rows,128): independent elementwise vreg
        # add chains; the cross-lane reduce happens once, outside the kernel.
        out_ref[...] += jnp.sum(loss.reshape(-1, acc_rows, LANES), axis=0)

    def full_block():
        p = pred_ref[...].astype(jnp.float32)
        g = gt_ref[...].astype(jnp.float32)
        # mask = (gt > 0); single select on the VPU (keep select form: garbage
        # in OOB rows must never multiply through).
        accumulate(jnp.where(g > 0, p - g, jnp.float32(0.0)))

    def tail_block():
        p = pred_ref[...].astype(jnp.float32)
        g = gt_ref[...].astype(jnp.float32)
        row_ids = row0 + jax.lax.broadcasted_iota(
            jnp.int32, (tile_rows, LANES), 0)
        valid = row_ids < total_rows
        accumulate(jnp.where(jnp.logical_and(valid, g > 0), p - g,
                             jnp.float32(0.0)))

    def body():
        if has_tail:
            is_full = row0 + tile_rows <= total_rows
            pl.when(is_full)(full_block)
            pl.when(jnp.logical_not(is_full))(tail_block)
        else:
            full_block()

    if needs_oob_guard:
        # Clamped duplicate blocks: skip all VPU work (DMA already happened).
        pl.when(row0 < total_rows)(body)
    else:
        body()


def huber_delta1_loss(prediction, gt, inp=None):
    """Equivalent of Huber_delta1_loss().forward(prediction, gt, input)."""
    del inp  # unused by the reference module
    assert prediction.shape == gt.shape

    n_elems = int(prediction.size)  # mean is over the ORIGINAL element count
    if n_elems == 0:
        return jnp.float32(jnp.nan)  # torch.mean of empty tensor is nan

    p_flat = prediction.reshape(-1)
    g_flat = gt.reshape(-1)

    # Only pad the ragged lane tail (<= 127 elements); padded gt == 0 so the
    # mask zeroes its contribution. No full-array padding pass, no host upcast.
    rem = n_elems % LANES
    if rem:
        pad = LANES - rem
        p_flat = jnp.pad(p_flat, (0, pad))
        g_flat = jnp.pad(g_flat, (0, pad))

    rows = p_flat.size // LANES
    p2 = p_flat.reshape(rows, LANES)
    g2 = g_flat.reshape(rows, LANES)

    def run(ncores):
        # Tile granularity: 64 rows (wide accumulator) for real workloads,
        # 8 rows for tiny inputs so the block never dwarfs the array.
        gran = ACC_ROWS if _cdiv(rows, ncores) >= ACC_ROWS else SUBLANES
        tile_rows = min(MAX_TILE_ROWS, _round_up(_cdiv(rows, ncores), gran))
        acc_rows = gran

        total_blocks = _cdiv(rows, tile_rows)
        steps_per_core = _cdiv(total_blocks, ncores)
        needs_oob_guard = ncores * steps_per_core > total_blocks
        has_tail = (rows % tile_rows) != 0

        def in_map(c, i):
            b = c * steps_per_core + i
            # Clamp so no DMA is fully out of bounds; the in-kernel guard
            # (from the UNCLAMPED logical index) skips duplicate blocks.
            return (jnp.minimum(b, total_blocks - 1), 0)

        kernel = functools.partial(
            _huber_kernel,
            total_rows=rows,
            tile_rows=tile_rows,
            steps_per_core=steps_per_core,
            acc_rows=acc_rows,
            has_tail=has_tail,
            needs_oob_guard=needs_oob_guard,
        )

        # 2 buffers per input x (pred + gt) tile bytes, plus headroom for the
        # output block / compiler scratch.  Well within physical VMEM on
        # v5e/v6e (128 MiB) and v7x (64 MiB).
        itemsize = (jnp.dtype(prediction.dtype).itemsize
                    + jnp.dtype(gt.dtype).itemsize)
        vmem_limit = int(2 * tile_rows * LANES * itemsize + (8 << 20))

        dim0 = pltpu.CORE_PARALLEL if ncores > 1 else pltpu.ARBITRARY

        return pl.pallas_call(
            kernel,
            out_shape=jax.ShapeDtypeStruct((ncores * acc_rows, LANES),
                                           jnp.float32),
            grid_spec=pltpu.PrefetchScalarGridSpec(
                num_scalar_prefetch=0,
                grid=(ncores, steps_per_core),
                in_specs=[
                    pl.BlockSpec((tile_rows, LANES), in_map),
                    pl.BlockSpec((tile_rows, LANES), in_map),
                ],
                out_specs=pl.BlockSpec((acc_rows, LANES), lambda c, i: (c, 0)),
            ),
            compiler_params=pltpu.CompilerParams(
                dimension_semantics=(dim0, pltpu.ARBITRARY),
                vmem_limit_bytes=vmem_limit,
            ),
        )(p2, g2)

    ncores = _num_tensorcores()
    try:
        partials = run(ncores)
    except Exception:
        if ncores == 1:
            raise
        # Multi-core (CORE_PARALLEL) path unsupported here -> safe 1-core path.
        partials = run(1)

    # Tiny final cross-lane reduce + normalization in plain JAX.
    return jnp.sum(partials) / jnp.float32(n_elems)


def _reference(prediction, gt):
    mask = (gt > 0).astype(jnp.float32)
    d = prediction * mask - gt * mask
    ad = jnp.abs(d)
    loss = jnp.where(ad < 1.0, 0.5 * d * d, ad - 0.5)
    return jnp.mean(loss)


if __name__ == "__main__":
    key = jax.random.PRNGKey(0)
    k1, k2, k3 = jax.random.split(key, 3)

    # Small NCHW-shaped inputs consistent with a depth-prediction loss.
    shape = (2, 4, 16, 16)
    prediction = jax.random.normal(k1, shape, dtype=jnp.float32)
    # gt: mix of positive depths and zeros (invalid pixels) so the mask matters.
    gt = jax.random.normal(k2, shape, dtype=jnp.float32) * 2.0
    gt = jnp.where(gt > 0, gt, 0.0)
    inp = jax.random.normal(k3, shape, dtype=jnp.float32)  # unused, like PyTorch

    out = jax.block_until_ready(huber_delta1_loss(prediction, gt, inp))
    ref = _reference(prediction, gt)
    assert jnp.allclose(out, ref, atol=1e-6, rtol=1e-5), (out, ref)

    # Second check: ragged shape exercises the lane-tail pad + partial
    # (tail-masked) block path.
    shape2 = (3, 5, 7, 11)
    p2 = jax.random.normal(jax.random.PRNGKey(7), shape2, dtype=jnp.float32)
    g2 = jax.random.normal(jax.random.PRNGKey(8), shape2, dtype=jnp.float32)
    g2 = jnp.where(g2 > 0, g2 * 3.0, 0.0)
    out2 = jax.block_until_ready(huber_delta1_loss(p2, g2))
    ref2 = _reference(p2, g2)
    assert jnp.allclose(out2, ref2, atol=1e-6, rtol=1e-5), (out2, ref2)

    print("KERNEL_OK")
</pallas_src>

<mosaic_0001>
module attributes {stable_mosaic.version = 11 : i64} {
  func.func @_huber_kernel(%arg0: i32, %arg1: i32, %arg2: memref<16x128xf32, #tpu.memory_space<vmem>>, %arg3: memref<16x128xf32, #tpu.memory_space<vmem>>, %arg4: memref<8x128xf32, #tpu.memory_space<vmem>>) attributes {dimension_semantics = [#tpu.dimension_semantics<arbitrary>, #tpu.dimension_semantics<arbitrary>], iteration_bounds = array<i64: 1, 1>, scalar_prefetch = 0 : i64, scratch_operands = 0 : i64, tpu.core_type = #tpu.core_type<tc>, window_params = [{transform_indices = @transform_0, window_bounds = array<i64: 16, 128>}, {transform_indices = @transform_1, window_bounds = array<i64: 16, 128>}, {transform_indices = @transform_2, window_bounds = array<i64: 8, 128>}]} {
    %c0_i32 = arith.constant 0 : i32
    %0 = arith.cmpi eq, %arg1, %c0_i32 : i32
    %1 = arith.extui %0 : i1 to i32
    %c0_i32_0 = arith.constant 0 : i32
    %2 = arith.cmpi ne, %1, %c0_i32_0 : i32
    scf.if %2 {
      %cst_13 = arith.constant 0.000000e+00 : f32
      %24 = vector.broadcast %cst_13 : f32 to vector<8x128xf32>
      %c0_14 = arith.constant 0 : index
      %c0_15 = arith.constant 0 : index
      %25 = vector.load %arg4[%c0_14, %c0_15] : memref<8x128xf32, #tpu.memory_space<vmem>>, vector<8x128xf32>
      tpu.vector_store %arg4[%c0_14, %c0_15], %24 {strides = array<i32>} : memref<8x128xf32, #tpu.memory_space<vmem>>, vector<8x128xf32>,
    } else {
    }
    %c0 = arith.constant 0 : index
    %c0_1 = arith.constant 0 : index
    %3 = vector.load %arg2[%c0, %c0_1] : memref<16x128xf32, #tpu.memory_space<vmem>>, vector<16x128xf32>
    %c0_2 = arith.constant 0 : index
    %c0_3 = arith.constant 0 : index
    %4 = vector.load %arg3[%c0_2, %c0_3] : memref<16x128xf32, #tpu.memory_space<vmem>>, vector<16x128xf32>
    %cst = arith.constant 0.000000e+00 : f32
    %5 = vector.broadcast %cst : f32 to vector<16x128xf32>
    %6 = arith.cmpf ogt, %4, %5 : vector<16x128xf32>
    %7 = arith.subf %3, %4 : vector<16x128xf32>
    %cst_4 = arith.constant 0.000000e+00 : f32
    %8 = vector.broadcast %cst_4 : f32 to vector<16x128xf32>
    %9 = arith.select %6, %7, %8 : vector<16x128xi1>, vector<16x128xf32>
    %10 = math.absf %9 : vector<16x128xf32>
    %cst_5 = arith.constant 1.000000e+00 : f32
    %11 = vector.broadcast %cst_5 : f32 to vector<16x128xf32>
    %12 = arith.cmpf olt, %10, %11 : vector<16x128xf32>
    %cst_6 = arith.constant 5.000000e-01 : f32
    %13 = vector.broadcast %cst_6 : f32 to vector<16x128xf32>
    %14 = arith.mulf %13, %9 : vector<16x128xf32>
    %15 = arith.mulf %14, %9 : vector<16x128xf32>
    %cst_7 = arith.constant 5.000000e-01 : f32
    %16 = vector.broadcast %cst_7 : f32 to vector<16x128xf32>
    %17 = arith.subf %10, %16 : vector<16x128xf32>
    %18 = arith.select %12, %15, %17 : vector<16x128xi1>, vector<16x128xf32>
    %c0_8 = arith.constant 0 : index
    %c0_9 = arith.constant 0 : index
    %19 = vector.load %arg4[%c0_8, %c0_9] : memref<8x128xf32, #tpu.memory_space<vmem>>, vector<8x128xf32>
    %20 = vector.shape_cast %18 : vector<16x128xf32> to vector<2x8x128xf32>
    %cst_10 = arith.constant dense<0.000000e+00> : vector<8x128xf32>
    %21 = vector.multi_reduction <add>, %20, %cst_10 [0] : vector<2x8x128xf32> to vector<8x128xf32>
    %22 = arith.addf %19, %21 : vector<8x128xf32>
    %c0_11 = arith.constant 0 : index
    %c0_12 = arith.constant 0 : index
    %23 = vector.load %arg4[%c0_11, %c0_12] : memref<8x128xf32, #tpu.memory_space<vmem>>, vector<8x128xf32>
    tpu.vector_store %arg4[%c0_11, %c0_12], %22 {strides = array<i32>} : memref<8x128xf32, #tpu.memory_space<vmem>>, vector<8x128xf32>,
    return
  }
  func.func @transform_0(%arg0: i32, %arg1: i32) -> (i32, i32) {
    %c1_i32 = arith.constant 1 : i32
    %0 = arith.muli %arg0, %c1_i32 : i32
    %1 = arith.addi %0, %arg1 : i32
    %c0_i32 = arith.constant 0 : i32
    %2 = arith.minsi %1, %c0_i32 : i32
    %c0_i32_0 = arith.constant 0 : i32
    %c0_i32_1 = arith.constant 0 : i32
    return %2, %c0_i32_0 : i32, i32
  }
  func.func @transform_1(%arg0: i32, %arg1: i32) -> (i32, i32) {
    %c1_i32 = arith.constant 1 : i32
    %0 = arith.muli %arg0, %c1_i32 : i32
    %1 = arith.addi %0, %arg1 : i32
    %c0_i32 = arith.constant 0 : i32
    %2 = arith.minsi %1, %c0_i32 : i32
    %c0_i32_0 = arith.constant 0 : i32
    %c0_i32_1 = arith.constant 0 : i32
    return %2, %c0_i32_0 : i32, i32
  }
  func.func @transform_2(%arg0: i32, %arg1: i32) -> (i32, i32) {
    %c0_i32 = arith.constant 0 : i32
    %c0_i32_0 = arith.constant 0 : i32
    return %arg0, %c0_i32 : i32, i32
  }
}

</mosaic_0001>

<bundles_post_ra>
// kernel: tpu_custom_call.1
= control target key start
LH: loop header
LB: loop body
LE: loop exit
PB: predicated region body
PF: predicated region fallthrough
CT: control target
= control target key end

     0   :  { %7 = vsyncpa [#allocation3], 0  ;;  %s247_s0 = inlined_call_operand.hbm [shape: f32[16,128], index: 0, kind: input, shape index: {}]   ;;  %s248_s1 = inlined_call_operand.hbm [shape: f32[16,128], index: 1, kind: input, shape index: {}]   ;;  %s249_s2 = inlined_call_operand.hbm [shape: f32[8,128], index: 2, kind: output, shape index: {}]  }
   0x1   :  { %8 = vsyncpa [#allocation6], 0 }
   0x2   :  { %9 = vsyncpa [#allocation4], 0  ;;  %s191_s9 = smov [#allocation2]   ;;  %s119_s13 = scalar_lea.hbm %s247_s0, 256 }
   0x3   :  { %s21_s10 = sshll.u32 %s191_s9, 4  ;;  %p120_p0 = scmp.ne.s32.totalorder %s247_s0, %s119_s13  ;;  %s22_s10 = int_to_ptr.vmem [resolvable:$true] %s21_s10 }
   0x4   :  { %p123_p1 = scmp.lt.u32.totalorder %s119_s13, %s247_s0 }
   0x6   :  { %p125_p2 = pnand %p123_p1, %p120_p0 }
   0x8   :  { %128 = shalt.err (!%p125_p2)
}
   0x9   :  { %s129_s18 = scalar_lea.vmem %s22_s10, 256  ;;  %p134_p4 = scmp.lt.s32.totalorder %s22_s10, %s22_s10 }
   0xa   :  { %p130_p3 = scmp.ne.s32.totalorder %s22_s10, %s129_s18  ;;  %p135_p5 = scmp.lt.s32.totalorder %s129_s18, %s129_s18 }
   0xc   :  { %p136_p6 = por %p135_p5, %p134_p4 }
   0xe   :  { %p137_p7 = pnand %p136_p6, %p130_p3 }
  0x10   :  { %140 = shalt.err (!%p137_p7)
}
  0x11   :  { %s192_s19 = smov 128   ;;  %s193_s20 = smov 8  }
  0x12   :  { %27 = dma.hbm_to_vmem [thread:$0]  %s247_s0, 256, %s22_s10, [#allocation3], %s192_s19, %s192_s19, %s193_s20  }
  0x13   :  { %s194_s23 = smov [#allocation5]   ;;  %s141_s27 = scalar_lea.hbm %s248_s1, 256 }
  0x14   :  { %s39_s24 = sshll.u32 %s194_s23, 4  ;;  %p142_p8 = scmp.ne.s32.totalorder %s248_s1, %s141_s27  ;;  %s40_s24 = int_to_ptr.vmem [resolvable:$true] %s39_s24 }
  0x15   :  { %p145_p9 = scmp.lt.u32.totalorder %s141_s27, %s248_s1 }
  0x17   :  { %p147_p10 = pnand %p145_p9, %p142_p8 }
  0x19   :  { %150 = shalt.err (!%p147_p10)
}
  0x1a   :  { %s151_s4 = scalar_lea.vmem %s40_s24, 256  ;;  %p156_p12 = scmp.lt.s32.totalorder %s40_s24, %s40_s24 }
  0x1b   :  { %p152_p11 = scmp.ne.s32.totalorder %s40_s24, %s151_s4  ;;  %p157_p13 = scmp.lt.s32.totalorder %s151_s4, %s151_s4 }
  0x1d   :  { %p158_p0 = por %p157_p13, %p156_p12 }
  0x1f   :  { %p159_p1 = pnand %p158_p0, %p152_p11 }
  0x21   :  { %162 = shalt.err (!%p159_p1)
}
  0x22   :  { %45 = dma.hbm_to_vmem [thread:$0]  %s248_s1, 256, %s40_s24, [#allocation6], %s192_s19, %s192_s19, %s193_s20  }
  0x23   :  { %185 = dma.done.wait [#allocation3], 256  }
  0x24   :  { %186 = vsyncadd [#allocation3], 4294967040 }
  0x25   :  { %187 = dma.done.wait [#allocation6], 256  }
  0x26   :  { %188 = vsyncadd [#allocation6], 4294967040  ;;  %v65_v0 = vld [vmem:[#allocation2] sm:$0xff]  ;;  %v66_v1 = vld [vmem:[#allocation2 + $0x8] sm:$0xff]  ;;  %s195_s1 = smov [#allocation7]  }
  0x27   :  { %v67_v2 = vld [vmem:[#allocation5] sm:$0xff]  ;;  %v68_v3 = vld [vmem:[#allocation5 + $0x8] sm:$0xff]  ;;  %s97_s6 = sshll.u32 %s195_s1, 4  ;;  %s98_s6 = int_to_ptr.vmem [resolvable:$true] %s97_s6 }
  0x28   :  { %vm69_vm0 = vcmp.gt.f32.partialorder %v67_v2, 0.0  ;;  %v71_v4 = vsub.f32 %v65_v0, %v67_v2  ;;  %vm70_vm1 = vcmp.gt.f32.partialorder %v68_v3, 0.0  ;;  %v72_v5 = vsub.f32 %v66_v1, %v68_v3  ;;  %s163_s7 = scalar_lea.vmem %s98_s6, 128  ;;  %p168_p3 = scmp.lt.s32.totalorder %s98_s6, %s98_s6 }
  0x29   :  { %p164_p2 = scmp.ne.s32.totalorder %s98_s6, %s163_s7  ;;  %p169_p4 = scmp.lt.s32.totalorder %s163_s7, %s163_s7 }
  0x2a   :  { %v73_v6 = vsel %vm69_vm0, %v71_v4, 0.0  ;;  %v74_v7 = vsel %vm70_vm1, %v72_v5, 0.0 }
  0x2b   :  { %v75_v8 = vand.u32 2147483647, %v73_v6  ;;  %v79_v9 = vmul.f32 0.5, %v73_v6  ;;  %v76_v10 = vand.u32 2147483647, %v74_v7  ;;  %v80_v11 = vmul.f32 0.5, %v74_v7  ;;  %p170_p5 = por %p169_p4, %p168_p3 }
  0x2d   :  { %vm77_vm2 = vcmp.lt.f32.partialorder %v75_v8, 1.0  ;;  %v81_v12 = vmul.f32 %v79_v9, %v73_v6  ;;  %v111_v13 = vadd.f32 -0.5, %v75_v8  ;;  %vm78_vm3 = vcmp.lt.f32.partialorder %v76_v10, 1.0  ;;  %p171_p6 = pnand %p170_p5, %p164_p2 }
  0x2e   :  { %v82_v14 = vmul.f32 %v80_v11, %v74_v7  ;;  %v112_v15 = vadd.f32 -0.5, %v76_v10 }
  0x2f   :  { %v85_v16 = vsel %vm77_vm2, %v81_v12, %v111_v13 }
  0x30   :  { %v86_v17 = vsel %vm78_vm3, %v82_v14, %v112_v15 }
  0x31   :  { %v88_v18 = vadd.f32 %v86_v17, %v85_v16 }
  0x33   :  { %90 = vst [vmem:[#allocation7] sm:$0xff] %v88_v18 }
  0x34   :  { %174 = shalt.err (!%p171_p6)
}
  0x35   :  { %s175_s10 = scalar_lea.hbm %s249_s2, 128 }
  0x36   :  { %p176_p7 = scmp.ne.s32.totalorder %s249_s2, %s175_s10  ;;  %p179_p8 = scmp.lt.u32.totalorder %s175_s10, %s249_s2 }
  0x38   :  { %p181_p9 = pnand %p179_p8, %p176_p7 }
  0x3a   :  { %184 = shalt.err (!%p181_p9)
}
  0x3b   :  { %100 = dma.vmem_to_hbm [thread:$0]  %s98_s6, 128, %s249_s2, [#allocation4]  }
  0x3c   :  { %189 = dma.done.wait [#allocation4], 128  }
  0x3d   :  { %190 = vsyncadd [#allocation4], 4294967168 }
  0x3e   :  { %104 = vsyncpa [#allocation3], 1 }
  0x3f   :  { %105 = vsyncpa [#allocation6], 1 }
  0x40   :  { %106 = vsyncpa [#allocation4], 1 }

</bundles_post_ra>
